<compile_context>
chip_gen: v7x
topology: tpu7x:2x2x1
jax: 0.10.0
libtpu: 0.0.40
codegen_flags: <defaults>
</compile_context>

<pallas_src>
import numpy as np
import jax
import jax.numpy as jnp
from jax import lax
from jax.experimental import pallas as pl
from jax.experimental.pallas import tpu as pltpu


# ----------------------------------- kernel -----------------------------------

def preact_basic_block_kernel(x_ref, mask_ref, w1_ref, w2_ref,
                              s1_ref, b1_ref, s2_ref, b2_ref, o_ref):
    """One batch-fused, row-padded slab per grid step.

    x_ref:    (M_pad, W*Cin)    lane-dense rows; per-image layout is
                                [halo, h=0..H-1, halo], plus zero tail padding.
    mask_ref: (M_pad, 1)        1.0 on real image rows, 0.0 on halo/pad rows.
    w1_ref:   (3*W*Cin, W*Cout)           conv1, ky taps K-stacked (kx folded in).
    w2_ref:   (3*W*Cout + W*Cin, W*Cout)  conv2 ky-stacked + 1x1 downsample stacked.
    s*/b*:    (1, W*C)          folded eval-mode BatchNorm scale/shift, tiled over W.
    o_ref:    (M_pad, W*Cout)   row-padded output slab (halo rows are garbage and are
                                discarded by the wrapper).
    """
    x = x_ref[...]
    mask = mask_ref[...]
    w1 = w1_ref[...]
    w2 = w2_ref[...]
    m = x.shape[0]

    # ---- norm1 (folded BN) + ReLU on raw x; halo/pad rows forced back to zero ----
    pre1 = jnp.maximum(x * s1_ref[...] + b1_ref[...], 0.0) * mask

    # ---- conv1: single MXU matmul, ky taps stacked along K.  Row shifts come from
    # sublane rolls on in-vreg data; circular wrap-around only feeds rows whose output
    # is discarded (and those source rows are zero anyway).
    lhs1 = jnp.concatenate(
        [pltpu.roll(pre1, shift=1, axis=0),        # reads row r-1  (ky = 0)
         pre1,                                     # row r          (ky = 1)
         pltpu.roll(pre1, shift=m - 1, axis=0)],   # row r+1        (ky = 2)
        axis=1)
    acc1 = jnp.dot(lhs1.astype(w1.dtype), w1, preferred_element_type=jnp.float32)

    # ---- norm2 + ReLU ----
    pre2 = jnp.maximum(acc1 * s2_ref[...] + b2_ref[...], 0.0) * mask

    # ---- conv2 (ky-stacked) + 1x1 downsample on raw x, fused into ONE matmul ----
    lhs2 = jnp.concatenate(
        [pltpu.roll(pre2, shift=1, axis=0),
         pre2,
         pltpu.roll(pre2, shift=m - 1, axis=0),
         x],
        axis=1)
    acc2 = jnp.dot(lhs2.astype(w2.dtype), w2, preferred_element_type=jnp.float32)

    o_ref[...] = acc2.astype(o_ref.dtype)


# ----------------------------------- wrapper -----------------------------------

def _choose_images_per_step(N, H, target_rows=256, min_rows_per_core=128):
    """Largest divisor B of N with B*(H+2) <= target_rows (maximize M per matmul).
    If the whole batch fits one step but halving still keeps >=128 rows per step,
    use two parallel steps so v7x can spread them across its two TensorCores."""
    R = H + 2
    divisors = [b for b in range(1, N + 1) if N % b == 0]
    fitting = [b for b in divisors if b * R <= target_rows]
    B = max(fitting) if fitting else 1
    if B == N and N % 2 == 0 and (N // 2) * R >= min_rows_per_core:
        B = N // 2
    return B


def preact_basic_block(x_nhwc, w1_stacked, w2ds_stacked, s1t, b1t, s2t, b2t,
                       *, images_per_step=None, mxu_dtype=jnp.float32):
    """x_nhwc: (N, H, W, Cin) f32.  Returns (N, H, W, Cout) f32.

    mxu_dtype=jnp.bfloat16 halves weight DMA / VMEM and runs the MXU at native bf16
    rate (accumulation stays f32); the 1e-4 test tolerance needs relaxing for that.
    """
    N, H, W, Cin = x_nhwc.shape
    WCin = W * Cin
    WCout = w1_stacked.shape[-1]
    Cout = WCout // W
    R = H + 2

    B = images_per_step if images_per_step is not None else _choose_images_per_step(N, H)
    assert N % B == 0, "images_per_step must divide the batch"
    num_steps = N // B
    M_valid = B * R
    M_pad = ((M_valid + 7) // 8) * 8          # sublane-aligned rows per grid step

    # Lane-dense, row-padded slab (layout plumbing only): per image, rows [1..H] are
    # real data, rows 0 and H+1 are zero halos; zero tail padding up to M_pad.
    x_slab = x_nhwc.reshape(num_steps, B, H, WCin)
    x_slab = jnp.pad(x_slab, ((0, 0), (0, 0), (1, 1), (0, 0)))
    x_slab = x_slab.reshape(num_steps, M_valid, WCin)
    x_slab = jnp.pad(x_slab, ((0, 0), (0, M_pad - M_valid), (0, 0)))
    x_slab = x_slab.reshape(num_steps * M_pad, WCin)

    # Real-row mask (identical for every grid step): 1 on image rows, 0 on halo/pad.
    rr = np.arange(M_pad)
    rem = rr % R
    mask_np = ((rr < M_valid) & (rem >= 1) & (rem <= H)).astype(np.float32)
    mask = jnp.asarray(mask_np.reshape(M_pad, 1))

    w1s = w1_stacked.astype(mxu_dtype)
    w2s = w2ds_stacked.astype(mxu_dtype)
    wbytes = np.dtype(mxu_dtype).itemsize

    K1 = w1s.shape[0]
    K2 = w2s.shape[0]
    flops = int(2 * num_steps * M_pad * WCout * (K1 + K2))
    bytes_accessed = int(
        (x_slab.size + num_steps * M_pad * WCout) * 4
        + (w1s.size + w2s.size) * wbytes
        + (s1t.size + b1t.size + s2t.size + b2t.size + mask.size) * 4)

    out_slab = pl.pallas_call(
        preact_basic_block_kernel,
        out_shape=jax.ShapeDtypeStruct((num_steps * M_pad, WCout), jnp.float32),
        grid=(num_steps,),
        in_specs=[
            pl.BlockSpec((M_pad, WCin), lambda n: (n, 0)),     # x slab for this step
            pl.BlockSpec((M_pad, 1), lambda n: (0, 0)),        # real-row mask
            pl.BlockSpec((K1, WCout), lambda n: (0, 0)),       # conv1 K-stacked weight
            pl.BlockSpec((K2, WCout), lambda n: (0, 0)),       # conv2 + downsample
            pl.BlockSpec((1, WCin), lambda n: (0, 0)),         # bn1 scale (lane-tiled)
            pl.BlockSpec((1, WCin), lambda n: (0, 0)),         # bn1 shift
            pl.BlockSpec((1, WCout), lambda n: (0, 0)),        # bn2 scale
            pl.BlockSpec((1, WCout), lambda n: (0, 0)),        # bn2 shift
        ],
        out_specs=pl.BlockSpec((M_pad, WCout), lambda n: (n, 0)),
        compiler_params=pltpu.CompilerParams(
            dimension_semantics=("parallel",),                 # v7x: steps across TCs
        ),
        cost_estimate=pl.CostEstimate(flops=flops, transcendentals=0,
                                      bytes_accessed=bytes_accessed),
    )(x_slab, mask, w1s, w2s, s1t, b1t, s2t, b2t)

    # Drop halo / tail-pad rows (cheap wrapper slice; keeps in-kernel stores dense).
    out = out_slab.reshape(num_steps, M_pad, WCout)[:, :M_valid]
    out = out.reshape(num_steps, B, R, W, Cout)[:, :, 1:H + 1]
    return out.reshape(N, H, W, Cout)


# ----------------------- host-side parameter folding (once) -----------------------

def fold_conv3x3_to_kstack(w_oihw, W):
    """OIHW (Cout,Cin,3,3) -> (3*W*Cin, W*Cout): ky-stacked banded-block weight
    (kx taps folded into the band; zero padding along W implicit)."""
    Cout, Cin = w_oihw.shape[0], w_oihw.shape[1]
    w = np.asarray(w_oihw, np.float32)
    band = np.zeros((3, W * Cin, W * Cout), np.float32)
    for ky in range(3):
        for kx in range(3):
            blk = w[:, :, ky, kx].T                     # (Cin, Cout)
            for xo in range(W):
                xi = xo + kx - 1                        # input column read by tap kx
                if 0 <= xi < W:
                    band[ky, xi * Cin:(xi + 1) * Cin,
                         xo * Cout:(xo + 1) * Cout] = blk
    return band.reshape(3 * W * Cin, W * Cout)          # [w[ky=0]; w[ky=1]; w[ky=2]]


def fold_conv1x1_to_diag(wd_oihw, W):
    """OIHW (Cout,Cin,1,1) -> block-diagonal (W*Cin, W*Cout) dense weight."""
    Cout, Cin = wd_oihw.shape[0], wd_oihw.shape[1]
    blk = np.asarray(wd_oihw, np.float32)[:, :, 0, 0].T  # (Cin, Cout)
    diag = np.zeros((W * Cin, W * Cout), np.float32)
    for xo in range(W):
        diag[xo * Cin:(xo + 1) * Cin, xo * Cout:(xo + 1) * Cout] = blk
    return diag


def build_weights(w1_oihw, w2_oihw, wd_oihw, W):
    """Returns (conv1 K-stacked weight, conv2 K-stacked weight with downsample fused)."""
    w1s = fold_conv3x3_to_kstack(w1_oihw, W)
    w2s = fold_conv3x3_to_kstack(w2_oihw, W)
    wd = fold_conv1x1_to_diag(wd_oihw, W)
    w2ds = np.concatenate([w2s, wd], axis=0)             # K = 3*W*Cout + W*Cin
    return jnp.asarray(w1s), jnp.asarray(w2ds)


def fold_bn(gamma, beta, mean, var, eps, W):
    """Eval-mode BatchNorm -> lane-tiled (1, W*C) scale/shift."""
    s = np.asarray(gamma, np.float32) / np.sqrt(np.asarray(var, np.float32) + eps)
    b = np.asarray(beta, np.float32) - np.asarray(mean, np.float32) * s
    return (jnp.asarray(np.tile(s, W).reshape(1, -1), dtype=jnp.float32),
            jnp.asarray(np.tile(b, W).reshape(1, -1), dtype=jnp.float32))


# ---------------------------------- test driver ----------------------------------

if __name__ == "__main__":
    N, Cin, H, W = 2, 4, 16, 16
    planes = 8                       # int(8 * (16/16)) * 1
    eps = 1e-5

    key = jax.random.PRNGKey(0)
    ks = jax.random.split(key, 12)

    # PyTorch conv weights (OIHW).
    w1_oihw = jax.random.normal(ks[0], (planes, Cin, 3, 3), jnp.float32) * 0.1
    w2_oihw = jax.random.normal(ks[1], (planes, planes, 3, 3), jnp.float32) * 0.1
    wd_oihw = jax.random.normal(ks[2], (planes, Cin, 1, 1), jnp.float32) * 0.1

    # BatchNorm parameters (eval mode).
    g1 = jax.random.uniform(ks[3], (Cin,), minval=0.5, maxval=1.5)
    be1 = jax.random.normal(ks[4], (Cin,)) * 0.1
    rm1 = jax.random.normal(ks[5], (Cin,)) * 0.1
    rv1 = jax.random.uniform(ks[6], (Cin,), minval=0.5, maxval=1.5)
    g2 = jax.random.uniform(ks[7], (planes,), minval=0.5, maxval=1.5)
    be2 = jax.random.normal(ks[8], (planes,)) * 0.1
    rm2 = jax.random.normal(ks[9], (planes,)) * 0.1
    rv2 = jax.random.uniform(ks[10], (planes,), minval=0.5, maxval=1.5)

    # Fold everything into the kernel's K-stacked, lane-dense layout (host-side, once).
    w1s, w2ds = build_weights(w1_oihw, w2_oihw, wd_oihw, W)
    s1t, b1t = fold_bn(g1, be1, rm1, rv1, eps, W)
    s2t, b2t = fold_bn(g2, be2, rm2, rv2, eps, W)

    # PyTorch input is NCHW; kernel works in NHWC / lane-dense rows.
    x_nchw = jax.random.normal(ks[11], (N, Cin, H, W), jnp.float32)
    x = jnp.transpose(x_nchw, (0, 2, 3, 1))

    out = jax.block_until_ready(
        preact_basic_block(x, w1s, w2ds, s1t, b1t, s2t, b2t))

    # ---- pure-JAX reference ----
    s1 = (g1 / jnp.sqrt(rv1 + eps)).reshape(1, 1, 1, Cin)
    b1 = (be1 - rm1 * g1 / jnp.sqrt(rv1 + eps)).reshape(1, 1, 1, Cin)
    s2 = (g2 / jnp.sqrt(rv2 + eps)).reshape(1, 1, 1, planes)
    b2 = (be2 - rm2 * g2 / jnp.sqrt(rv2 + eps)).reshape(1, 1, 1, planes)

    def conv3x3_ref(v, w_oihw):
        return lax.conv_general_dilated(
            v, jnp.transpose(w_oihw, (2, 3, 1, 0)), (1, 1), 'SAME',
            dimension_numbers=('NHWC', 'HWIO', 'NHWC'))

    pre1 = jax.nn.relu(x * s1 + b1)
    o1 = conv3x3_ref(pre1, w1_oihw)
    pre2 = jax.nn.relu(o1 * s2 + b2)
    o2 = conv3x3_ref(pre2, w2_oihw)
    ds = jnp.einsum('nhwc,co->nhwo', x, wd_oihw[:, :, 0, 0].T)
    ref = o2 + ds

    np.testing.assert_allclose(np.asarray(out), np.asarray(ref), rtol=1e-4, atol=1e-4)
    print("KERNEL_OK")
</pallas_src>

<mosaic_0001>
module attributes {stable_mosaic.version = 11 : i64} {
  func.func @preact_basic_block_kernel(%arg0: i32, %arg1: memref<40x64xf32, #tpu.memory_space<vmem>>, %arg2: memref<40x1xf32, #tpu.memory_space<vmem>>, %arg3: memref<192x128xf32, #tpu.memory_space<vmem>>, %arg4: memref<448x128xf32, #tpu.memory_space<vmem>>, %arg5: memref<1x64xf32, #tpu.memory_space<vmem>>, %arg6: memref<1x64xf32, #tpu.memory_space<vmem>>, %arg7: memref<1x128xf32, #tpu.memory_space<vmem>>, %arg8: memref<1x128xf32, #tpu.memory_space<vmem>>, %arg9: memref<40x128xf32, #tpu.memory_space<vmem>>) attributes {dimension_semantics = [#tpu.dimension_semantics<parallel>], iteration_bounds = array<i64: 1>, scalar_prefetch = 0 : i64, scratch_operands = 0 : i64, tpu.core_type = #tpu.core_type<tc>, window_params = [{transform_indices = @transform_0, window_bounds = array<i64: 40, 64>}, {pipeline_mode = #tpu.pipeline_mode<synchronous>, transform_indices = @transform_1, window_bounds = array<i64: 40, 1>}, {pipeline_mode = #tpu.pipeline_mode<synchronous>, transform_indices = @transform_2, window_bounds = array<i64: 192, 128>}, {pipeline_mode = #tpu.pipeline_mode<synchronous>, transform_indices = @transform_3, window_bounds = array<i64: 448, 128>}, {pipeline_mode = #tpu.pipeline_mode<synchronous>, transform_indices = @transform_4, window_bounds = array<i64: 1, 64>}, {pipeline_mode = #tpu.pipeline_mode<synchronous>, transform_indices = @transform_5, window_bounds = array<i64: 1, 64>}, {pipeline_mode = #tpu.pipeline_mode<synchronous>, transform_indices = @transform_6, window_bounds = array<i64: 1, 128>}, {pipeline_mode = #tpu.pipeline_mode<synchronous>, transform_indices = @transform_7, window_bounds = array<i64: 1, 128>}, {transform_indices = @transform_8, window_bounds = array<i64: 40, 128>}]} {
    %c0 = arith.constant 0 : index
    %c0_0 = arith.constant 0 : index
    %0 = vector.load %arg1[%c0, %c0_0] : memref<40x64xf32, #tpu.memory_space<vmem>>, vector<40x64xf32>
    %c0_1 = arith.constant 0 : index
    %c0_2 = arith.constant 0 : index
    %1 = vector.load %arg2[%c0_1, %c0_2] : memref<40x1xf32, #tpu.memory_space<vmem>>, vector<40x1xf32>
    %c0_3 = arith.constant 0 : index
    %c0_4 = arith.constant 0 : index
    %2 = vector.load %arg3[%c0_3, %c0_4] : memref<192x128xf32, #tpu.memory_space<vmem>>, vector<192x128xf32>
    %c0_5 = arith.constant 0 : index
    %c0_6 = arith.constant 0 : index
    %3 = vector.load %arg4[%c0_5, %c0_6] : memref<448x128xf32, #tpu.memory_space<vmem>>, vector<448x128xf32>
    %c0_7 = arith.constant 0 : index
    %c0_8 = arith.constant 0 : index
    %4 = vector.load %arg5[%c0_7, %c0_8] : memref<1x64xf32, #tpu.memory_space<vmem>>, vector<1x64xf32>
    %5 = vector.broadcast %4 : vector<1x64xf32> to vector<40x64xf32>
    %6 = arith.mulf %0, %5 : vector<40x64xf32>
    %c0_9 = arith.constant 0 : index
    %c0_10 = arith.constant 0 : index
    %7 = vector.load %arg6[%c0_9, %c0_10] : memref<1x64xf32, #tpu.memory_space<vmem>>, vector<1x64xf32>
    %8 = vector.broadcast %7 : vector<1x64xf32> to vector<40x64xf32>
    %9 = arith.addf %6, %8 : vector<40x64xf32>
    %cst = arith.constant 0.000000e+00 : f32
    %10 = vector.broadcast %cst : f32 to vector<40x64xf32>
    %11 = arith.maximumf %9, %10 : vector<40x64xf32>
    %12 = vector.broadcast %1 : vector<40x1xf32> to vector<40x64xf32>
    %13 = arith.mulf %11, %12 : vector<40x64xf32>
    %c1_i32 = arith.constant 1 : i32
    %14 = tpu.dynamic_rotate %13 by %c1_i32 dim 0 : vector<40x64xf32>, i32 -> vector<40x64xf32>
    %c39_i32 = arith.constant 39 : i32
    %15 = tpu.dynamic_rotate %13 by %c39_i32 dim 0 : vector<40x64xf32>, i32 -> vector<40x64xf32>
    %16 = tpu.concatenate %14, %13, %15 in 1 : vector<40x64xf32>, vector<40x64xf32>, vector<40x64xf32> -> vector<40x192xf32>
    %cst_11 = arith.constant dense<0.000000e+00> : vector<40x128xf32>
    %17 = tpu.matmul %16, %2, %cst_11 {dimension_numbers = #tpu.dot_dimension_numbers<[1], [0], [0], [1], [0, 0, 1, 1], [], []>} : vector<40x192xf32>, vector<192x128xf32>, vector<40x128xf32> -> vector<40x128xf32>
    %c0_12 = arith.constant 0 : index
    %c0_13 = arith.constant 0 : index
    %18 = vector.load %arg7[%c0_12, %c0_13] : memref<1x128xf32, #tpu.memory_space<vmem>>, vector<1x128xf32>
    %19 = vector.broadcast %18 : vector<1x128xf32> to vector<40x128xf32>
    %20 = arith.mulf %17, %19 : vector<40x128xf32>
    %c0_14 = arith.constant 0 : index
    %c0_15 = arith.constant 0 : index
    %21 = vector.load %arg8[%c0_14, %c0_15] : memref<1x128xf32, #tpu.memory_space<vmem>>, vector<1x128xf32>
    %22 = vector.broadcast %21 : vector<1x128xf32> to vector<40x128xf32>
    %23 = arith.addf %20, %22 : vector<40x128xf32>
    %cst_16 = arith.constant 0.000000e+00 : f32
    %24 = vector.broadcast %cst_16 : f32 to vector<40x128xf32>
    %25 = arith.maximumf %23, %24 : vector<40x128xf32>
    %26 = vector.broadcast %1 : vector<40x1xf32> to vector<40x128xf32>
    %27 = arith.mulf %25, %26 : vector<40x128xf32>
    %c1_i32_17 = arith.constant 1 : i32
    %28 = tpu.dynamic_rotate %27 by %c1_i32_17 dim 0 : vector<40x128xf32>, i32 -> vector<40x128xf32>
    %c39_i32_18 = arith.constant 39 : i32
    %29 = tpu.dynamic_rotate %27 by %c39_i32_18 dim 0 : vector<40x128xf32>, i32 -> vector<40x128xf32>
    %30 = tpu.concatenate %28, %27, %29, %0 in 1 : vector<40x128xf32>, vector<40x128xf32>, vector<40x128xf32>, vector<40x64xf32> -> vector<40x448xf32>
    %cst_19 = arith.constant dense<0.000000e+00> : vector<40x128xf32>
    %31 = tpu.matmul %30, %3, %cst_19 {dimension_numbers = #tpu.dot_dimension_numbers<[1], [0], [0], [1], [0, 0, 1, 1], [], []>} : vector<40x448xf32>, vector<448x128xf32>, vector<40x128xf32> -> vector<40x128xf32>
    %c0_20 = arith.constant 0 : index
    %c0_21 = arith.constant 0 : index
    %32 = vector.load %arg9[%c0_20, %c0_21] : memref<40x128xf32, #tpu.memory_space<vmem>>, vector<40x128xf32>
    tpu.vector_store %arg9[%c0_20, %c0_21], %31 {strides = array<i32>} : memref<40x128xf32, #tpu.memory_space<vmem>>, vector<40x128xf32>,
    return
  }
  func.func @transform_0(%arg0: i32) -> (i32, i32) {
    %c0_i32 = arith.constant 0 : i32
    %c0_i32_0 = arith.constant 0 : i32
    return %arg0, %c0_i32 : i32, i32
  }
  func.func @transform_1(%arg0: i32) -> (i32, i32) {
    %c0_i32 = arith.constant 0 : i32
    %c0_i32_0 = arith.constant 0 : i32
    %c0_i32_1 = arith.constant 0 : i32
    return %c0_i32, %c0_i32_0 : i32, i32
  }
  func.func @transform_2(%arg0: i32) -> (i32, i32) {
    %c0_i32 = arith.constant 0 : i32
    %c0_i32_0 = arith.constant 0 : i32
    %c0_i32_1 = arith.constant 0 : i32
    return %c0_i32, %c0_i32_0 : i32, i32
  }
  func.func @transform_3(%arg0: i32) -> (i32, i32) {
    %c0_i32 = arith.constant 0 : i32
    %c0_i32_0 = arith.constant 0 : i32
    %c0_i32_1 = arith.constant 0 : i32
    return %c0_i32, %c0_i32_0 : i32, i32
  }
  func.func @transform_4(%arg0: i32) -> (i32, i32) {
    %c0_i32 = arith.constant 0 : i32
    %c0_i32_0 = arith.constant 0 : i32
    %c0_i32_1 = arith.constant 0 : i32
    return %c0_i32, %c0_i32_0 : i32, i32
  }
  func.func @transform_5(%arg0: i32) -> (i32, i32) {
    %c0_i32 = arith.constant 0 : i32
    %c0_i32_0 = arith.constant 0 : i32
    %c0_i32_1 = arith.constant 0 : i32
    return %c0_i32, %c0_i32_0 : i32, i32
  }
  func.func @transform_6(%arg0: i32) -> (i32, i32) {
    %c0_i32 = arith.constant 0 : i32
    %c0_i32_0 = arith.constant 0 : i32
    %c0_i32_1 = arith.constant 0 : i32
    return %c0_i32, %c0_i32_0 : i32, i32
  }
  func.func @transform_7(%arg0: i32) -> (i32, i32) {
    %c0_i32 = arith.constant 0 : i32
    %c0_i32_0 = arith.constant 0 : i32
    %c0_i32_1 = arith.constant 0 : i32
    return %c0_i32, %c0_i32_0 : i32, i32
  }
  func.func @transform_8(%arg0: i32) -> (i32, i32) {
    %c0_i32 = arith.constant 0 : i32
    %c0_i32_0 = arith.constant 0 : i32
    return %arg0, %c0_i32 : i32, i32
  }
}

</mosaic_0001>

<bundles_post_ra>
// kernel: tpu_custom_call.1
= control target key start
LH: loop header
LB: loop body
LE: loop exit
PB: predicated region body
PF: predicated region fallthrough
CT: control target
= control target key end

     0   :  { %13 = vsyncpa [#allocation3], 0  ;;  %s1164_s0 = inlined_call_operand.vmem [shape: f32[40,64], index: 0, kind: input, shape index: {}]   ;;  %s1165_s1 = inlined_call_operand.vmem [shape: f32[40,1], index: 1, kind: input, shape index: {}]   ;;  %s1166_s2 = inlined_call_operand.hbm [shape: f32[192,128], index: 2, kind: input, shape index: {}]   ;;  %s1167_s3 = inlined_call_operand.hbm [shape: f32[448,128], index: 3, kind: input, shape index: {}]   ;;  %s1168_s4 = inlined_call_operand.vmem [shape: f32[1,64], index: 4, kind: input, shape index: {}]   ;;  %s1169_s5 = inlined_call_operand.vmem [shape: f32[1,64], index: 5, kind: input, shape index: {}]   ;;  %s1170_s6 = inlined_call_operand.vmem [shape: f32[1,128], index: 6, kind: input, shape index: {}]   ;;  %s1171_s7 = inlined_call_operand.vmem [shape: f32[1,128], index: 7, kind: input, shape index: {}]   ;;  %s1172_s8 = inlined_call_operand.hbm [shape: f32[40,128], index: 8, kind: output, shape index: {}]  }
   0x1   :  { %14 = vsyncpa [#allocation6], 0 }
   0x2   :  { %15 = vsyncpa [#allocation4], 0  ;;  %s881_s27 = smov [#allocation2]   ;;  %s809_s9 = scalar_lea.hbm %s1166_s2, 3072 }
   0x3   :  { %s25_s28 = sshll.u32 %s881_s27, 4  ;;  %p810_p0 = scmp.ne.s32.totalorder %s1166_s2, %s809_s9  ;;  %s26_s28 = int_to_ptr.vmem [resolvable:$true] %s25_s28 }
   0x4   :  { %p813_p1 = scmp.lt.u32.totalorder %s809_s9, %s1166_s2 }
   0x6   :  { %p815_p2 = pnand %p813_p1, %p810_p0 }
   0x8   :  { %818 = shalt.err (!%p815_p2)
}
   0x9   :  { %s819_s14 = scalar_lea.vmem %s26_s28, 3072  ;;  %p824_p4 = scmp.lt.s32.totalorder %s26_s28, %s26_s28 }
   0xa   :  { %p820_p3 = scmp.ne.s32.totalorder %s26_s28, %s819_s14  ;;  %p825_p5 = scmp.lt.s32.totalorder %s819_s14, %s819_s14 }
   0xc   :  { %p826_p6 = por %p825_p5, %p824_p4 }
   0xe   :  { %p827_p7 = pnand %p826_p6, %p820_p3 }
  0x10   :  { %830 = shalt.err (!%p827_p7)
}
  0x11   :  { %s882_s15 = smov 128   ;;  %s883_s16 = smov 8  }
  0x12   :  { %31 = dma.hbm_to_vmem [thread:$0]  %s1166_s2, 3072, %s26_s28, [#allocation3], %s882_s15, %s882_s15, %s883_s16  }
  0x13   :  { %s884_s19 = smov [#allocation5]   ;;  %s831_s23 = scalar_lea.hbm %s1167_s3, 7168 }
  0x14   :  { %s37_s20 = sshll.u32 %s884_s19, 4  ;;  %p832_p8 = scmp.ne.s32.totalorder %s1167_s3, %s831_s23  ;;  %s38_s20 = int_to_ptr.vmem [resolvable:$true] %s37_s20 }
  0x15   :  { %p835_p9 = scmp.lt.u32.totalorder %s831_s23, %s1167_s3 }
  0x17   :  { %p837_p10 = pnand %p835_p9, %p832_p8 }
  0x19   :  { %840 = shalt.err (!%p837_p10)
}
  0x1a   :  { %s841_s29 = scalar_lea.vmem %s38_s20, 7168  ;;  %p846_p12 = scmp.lt.s32.totalorder %s38_s20, %s38_s20 }
  0x1b   :  { %p842_p11 = scmp.ne.s32.totalorder %s38_s20, %s841_s29  ;;  %p847_p13 = scmp.lt.s32.totalorder %s841_s29, %s841_s29 }
  0x1d   :  { %p848_p0 = por %p847_p13, %p846_p12 }
  0x1f   :  { %p849_p1 = pnand %p848_p0, %p842_p11 }
  0x21   :  { %852 = shalt.err (!%p849_p1)
}
  0x22   :  { %43 = dma.hbm_to_vmem [thread:$0]  %s1167_s3, 7168, %s38_s20, [#allocation6], %s882_s15, %s882_s15, %s883_s16  }
  0x23   :  { %875 = dma.done.wait [#allocation3], 3072  }
  0x24   :  { %876 = vsyncadd [#allocation3], 4294964224 }
  0x25   :  { %877 = dma.done.wait [#allocation6], 7168  }
  0x26   :  { %878 = vsyncadd [#allocation6], 4294960128  ;;  %v885_v0 = vmov 0   ;;  %v63_v1 = vld [vmem:[%s1165_s1] sm:$0xff]  ;;  %v65_v2 = vld [vmem:[%s1165_s1 + $0x10] sm:$0xff]  ;;  %v886_v9 = vmov 0.0|0.0   ;;  %v212_v57 = vlaneseq }
  0x27   :  { %807 = vset.pattern.permute.xlu0 %v885_v0  ;;  %808 = vset.pattern.permute.xlu1 %v885_v0  ;;  %v64_v3 = vld [vmem:[%s1165_s1 + $0x8] sm:$0xff]  ;;  %v66_v4 = vld [vmem:[%s1165_s1 + $0x18] sm:$0xff]  ;;  %v67_v5 = vld [vmem:[%s1165_s1 + $0x20] sm:$0xff]  ;;  %vm251_vm1 = vcmask 523264  }
  0x28   :  { %179 = vperm.xlu0 %807, %v63_v1   ;;  %189 = vperm.xlu1 %808, %v65_v2   ;;  %v68_v6 = vld [vmem:[#allocation2] sm:$0xff]  ;;  %v69_v7 = vld [vmem:[#allocation2 + $0x8] sm:$0xff]  ;;  %v70_v8 = vld [vmem:[#allocation2 + $0x10] sm:$0xff]  ;;  %v1031_v1 = vshrl.u32 %v212_v57, 7 }
  0x29   :  { %695 = vmatprep.subr.bf16.mxu0 %v886_v9  ;;  %v696_v10 = vpack.c.bf16 %v69_v7, %v68_v6  ;;  %v71_v11 = vld [vmem:[#allocation2 + $0x18] sm:$0xff]  ;;  %v72_v13 = vld [vmem:[#allocation2 + $0x20] sm:$0xff]  ;;  %v73_v14 = vld [vmem:[#allocation2 + $0x28] sm:$0xff] }
  0x2a   :  { %v699_v12 = vpack.c.bf16 %v71_v11, %v70_v8  ;;  %v702_v15 = vpack.c.bf16 %v73_v14, %v72_v13  ;;  %v74_v16 = vld [vmem:[#allocation2 + $0x30] sm:$0xff]  ;;  %v75_v17 = vld [vmem:[#allocation2 + $0x38] sm:$0xff]  ;;  %v76_v19 = vld [vmem:[#allocation2 + $0x40] sm:$0xff]  ;;  %vm225_vm0 = vcmp.lt.s32.totalorder %v1031_v1, 7  ;;  %vm214_vm2 = vcmp.lt.s32.totalorder %v1031_v1, 1 }
  0x2b   :  { %697 = vmatpush1.bf16.msra.mxu0 %v696_v10  ;;  %v705_v18 = vpack.c.bf16 %v75_v17, %v74_v16  ;;  %v77_v20 = vld [vmem:[#allocation2 + $0x48] sm:$0xff]  ;;  %v78_v22 = vld [vmem:[#allocation2 + $0x50] sm:$0xff]  ;;  %v79_v23 = vld [vmem:[#allocation2 + $0x58] sm:$0xff] }
  0x2c   :  { %184 = vperm.xlu0 %807, %v64_v3   ;;  %194 = vperm.xlu1 %808, %v66_v4   ;;  %v708_v21 = vpack.c.bf16 %v77_v20, %v76_v19  ;;  %v711_v24 = vpack.c.bf16 %v79_v23, %v78_v22  ;;  %v80_v25 = vld [vmem:[#allocation2 + $0x60] sm:$0xff]  ;;  %v81_v26 = vld [vmem:[#allocation2 + $0x68] sm:$0xff]  ;;  %v82_v28 = vld [vmem:[#allocation2 + $0x70] sm:$0xff] }
  0x2d   :  { %698 = vmatprep.subr.bf16.mxu0 %v886_v9  ;;  %v714_v27 = vpack.c.bf16 %v81_v26, %v80_v25  ;;  %v83_v29 = vld [vmem:[#allocation2 + $0x78] sm:$0xff]  ;;  %v84_v31 = vld [vmem:[#allocation2 + $0x80] sm:$0xff]  ;;  %v85_v32 = vld [vmem:[#allocation2 + $0x88] sm:$0xff] }
  0x2e   :  { %v717_v30 = vpack.c.bf16 %v83_v29, %v82_v28  ;;  %v720_v33 = vpack.c.bf16 %v85_v32, %v84_v31  ;;  %v86_v34 = vld [vmem:[#allocation2 + $0x90] sm:$0xff]  ;;  %v87_v35 = vld [vmem:[#allocation2 + $0x98] sm:$0xff]  ;;  %v88_v37 = vld [vmem:[#allocation2 + $0xa0] sm:$0xff] }
  0x2f   :  { %700 = vmatpush1.bf16.msra.mxu0 %v699_v12  ;;  %v723_v36 = vpack.c.bf16 %v87_v35, %v86_v34  ;;  %v89_v38 = vld [vmem:[#allocation2 + $0xa8] sm:$0xff]  ;;  %v90_v40 = vld [vmem:[#allocation2 + $0xb0] sm:$0xff]  ;;  %v91_v41 = vld [vmem:[#allocation2 + $0xb8] sm:$0xff] }
  0x30   :  { %199 = vperm.xlu0 %807, %v67_v5   ;;  %701 = vmatprep.subr.bf16.mxu0 %v886_v9  ;;  %v726_v39 = vpack.c.bf16 %v89_v38, %v88_v37  ;;  %v729_v42 = vpack.c.bf16 %v91_v41, %v90_v40  ;;  %v634_v43 = vld [vmem:[%s1168_s4] ss:$0 sm:$0xff]  ;;  %v1002_v45 = vld [vmem:[%s1164_s0 + $0x10] sm:$0xff]  ;;  %v1012_v49 = vld [vmem:[%s1164_s0 + $0x8] sm:$0xff] }
  0x31   :  { %v997_v44 = vld [vmem:[%s1164_s0] sm:$0xff]  ;;  %v157_v47 = vmul.f32 %v634_v43, %v1002_v45  ;;  %v1017_v50 = vld [vmem:[%s1164_s0 + $0x18] sm:$0xff]  ;;  %v156_v53 = vmul.f32 %v634_v43, %v1012_v49  ;;  %v93_v25 = vld [vmem:[#allocation5 + $0x8] sm:$0xff] }
  0x32   :  { %v155_v46 = vmul.f32 %v634_v43, %v997_v44  ;;  %v635_v48 = vld [vmem:[%s1169_s5] ss:$0 sm:$0xff]  ;;  %v158_v54 = vmul.f32 %v634_v43, %v1017_v50  ;;  %v110_v26 = vld [vmem:[#allocation5 + $0x90] sm:$0xff]  ;;  %v111_v31 = vld [vmem:[#allocation5 + $0x98] sm:$0xff] }
  0x33   :  { %703 = vmatpush1.bf16.msra.mxu0 %v702_v15  ;;  %v169_v52 = vadd.f32 %v635_v48, %v157_v47  ;;  %v1024_v55 = vld [vmem:[%s1164_s0 + $0x20] sm:$0xff]  ;;  %v168_v60 = vadd.f32 %v635_v48, %v156_v53  ;;  %s887_s0 = smov 64   ;;  %v735_v38 = vpack.c.bf16 %v111_v31, %v110_v26  ;;  %v103_v26 = vld [vmem:[#allocation5 + $0x58] sm:$0xff] }
  0x34   :  { %704 = vmatprep.subr.bf16.mxu0 %v886_v9  ;;  %v167_v51 = vadd.f32 %v635_v48, %v155_v46  ;;  %v159_v56 = vmul.f32 %v634_v43, %v1024_v55  ;;  %v170_v61 = vadd.f32 %v635_v48, %v158_v54  ;;  %v108_v20 = vld [vmem:[#allocation5 + $0x80] sm:$0xff] }
  0x35   :  { %v174_v59 = vmax.f32 %v169_v52, 0.0  ;;  %v173_v4 = vmax.f32 %v168_v60, 0.0  ;;  %v104_v31 = vld [vmem:[#allocation5 + $0x60] sm:$0xff] }
  0x36   :  { %v172_v58 = vmax.f32 %v167_v51, 0.0  ;;  %v171_v0 = vadd.f32 %v635_v48, %v159_v56  ;;  %v175_v5 = vmax.f32 %v170_v61, 0.0  ;;  %v112_v61 = vld [vmem:[#allocation5 + $0xa0] sm:$0xff] }
  0x37   :  { %706 = vmatpush1.bf16.msra.mxu0 %v705_v18 }
  0x38   :  { %707 = vmatprep.subr.bf16.mxu0 %v886_v9  ;;  %v176_v8 = vmax.f32 %v171_v0, 0.0  ;;  %v113_v0 = vld [vmem:[#allocation5 + $0xa8] sm:$0xff] }
  0x3b   :  { %709 = vmatpush1.bf16.msra.mxu0 %v708_v21  ;;  %v109_v21 = vld [vmem:[#allocation5 + $0x88] sm:$0xff] }
  0x3c   :  { %710 = vmatprep.subr.bf16.mxu0 %v886_v9  ;;  %v731_v23 = vpack.c.bf16 %v109_v21, %v108_v20  ;;  %v118_v21 = vld [vmem:[#allocation5 + $0xd0] sm:$0xff] }
  0x3e   :  { %732 = vmatprep.subr.bf16.mxu1 %v731_v23  ;;  %v119_v23 = vld [vmem:[#allocation5 + $0xd8] sm:$0xff] }
  0x3f   :  { %712 = vmatpush1.bf16.msra.mxu0 %v711_v24  ;;  %v92_v24 = vld [vmem:[#allocation5] sm:$0xff] }
  0x40   :  { %713 = vmatprep.subr.bf16.mxu0 %v886_v9  ;;  %v733_v37 = vpack.c.bf16 %v93_v25, %v92_v24  ;;  %v751_v24 = vpack.c.bf16 %v119_v23, %v118_v21  ;;  %v102_v25 = vld [vmem:[#allocation5 + $0x50] sm:$0xff] }
  0x42   :  { %734 = vmatpush3.bf16.msra.mxu1 %v733_v37  ;;  %v106_v37 = vld [vmem:[#allocation5 + $0x70] sm:$0xff] }
  0x43   :  { %715 = vmatpush1.bf16.msra.mxu0 %v714_v27  ;;  %736 = vmatprep.subr.bf16.mxu1 %v735_v38  ;;  %v107_v38 = vld [vmem:[#allocation5 + $0x78] sm:$0xff] }
  0x44   :  { %716 = vmatprep.subr.bf16.mxu0 %v886_v9 }
  0x47   :  { %718 = vmatpush1.bf16.msra.mxu0 %v717_v30 }
  0x48   :  { %719 = vmatprep.subr.bf16.mxu0 %v886_v9 }
  0x4b   :  { %721 = vmatpush1.bf16.msra.mxu0 %v720_v33 }
  0x4c   :  { %722 = vmatprep.subr.bf16.mxu0 %v886_v9 }
  0x4f   :  { %724 = vmatpush1.bf16.msra.mxu0 %v723_v36 }
  0x50   :  { %725 = vmatprep.subr.bf16.mxu0 %v886_v9 }
  0x53   :  { %727 = vmatpush1.bf16.msra.mxu0 %v726_v39 }
  0x54   :  { %728 = vmatprep.subr.bf16.mxu0 %v886_v9 }
  0x57   :  { %730 = vmatpush1.bf16.msra.mxu0 %v729_v42 }
  0xa7   :  { %v1027_v62 = vpop.permute.xlu0 %179  ;;  %v1029_v63 = vpop.permute.xlu1 %189 }
  0xa8   :  { %v202_v2 = vmul.f32 %v1027_v62, %v172_v58  ;;  %v204_v3 = vmul.f32 %v1029_v63, %v174_v59  ;;  %v94_v58 = vld [vmem:[#allocation5 + $0x10] sm:$0xff]  ;;  %v95_v59 = vld [vmem:[#allocation5 + $0x18] sm:$0xff] }
  0xa9   :  { %v737_v60 = vpack.c.bf16 %v95_v59, %v94_v58 }
  0xaa   :  { %236 = vrot.lane.b32.xlu1 %v202_v2, %s887_s0  ;;  %v222_v10 = vrot.slane %v204_v3, 1  ;;  %v207_v13 = vrot.slane %v202_v2, 7  ;;  %v209_v14 = vrot.slane %v204_v3, 7  ;;  %v220_v15 = vrot.slane %v202_v2, 1 }
  0xab   :  { %v1036_v6 = vpop.permute.xlu0 %184  ;;  %v1038_v7 = vpop.permute.xlu1 %194  ;;  %738 = vmatpush3.bf16.msra.mxu1 %v737_v60  ;;  %v739_v2 = vpack.c.bf16 %v113_v0, %v112_v61 }
  0xac   :  { %v203_v11 = vmul.f32 %v1036_v6, %v173_v4  ;;  %v205_v12 = vmul.f32 %v1038_v7, %v175_v5  ;;  %v97_v4 = vld [vmem:[#allocation5 + $0x28] sm:$0xff] }
  0xad   :  { %740 = vmatprep.subr.bf16.mxu1 %v739_v2 }
  0xae   :  { %v208_v16 = vrot.slane %v203_v11, 7  ;;  %238 = vrot.lane.b32.xlu0 %v203_v11, %s887_s0  ;;  %240 = vrot.lane.b32.xlu1 %v204_v3, %s887_s0  ;;  %v210_v17 = vrot.slane %v205_v12, 7  ;;  %v223_v18 = vrot.slane %v205_v12, 1  ;;  %v221_v19 = vrot.slane %v203_v11, 1  ;;  %v96_v3 = vld [vmem:[#allocation5 + $0x20] sm:$0xff] }
  0xaf   :  { %v1046_v22 = vpop.permute.xlu0 %199  ;;  %v741_v5 = vpack.c.bf16 %v97_v4, %v96_v3 }
  0xb0   :  { %v206_v27 = vmul.f32 %v1046_v22, %v176_v8  ;;  %v229_v28 = vsel %vm225_vm0, %v220_v15, %v221_v19  ;;  %v228_v29 = vsel %vm225_vm0, %v221_v19, %v222_v10  ;;  %v218_v30 = vsel %vm214_vm2, %v207_v13, %v208_v16  ;;  %v114_v8 = vld [vmem:[#allocation5 + $0xb0] sm:$0xff]  ;;  %v101_v19 = vld [vmem:[#allocation5 + $0x48] sm:$0xff] }
  0xb1   :  { %636 = vmatprep.mubr.msk.f32.mxu0 %vm251_vm1, %v229_v28  ;;  %v227_v32 = vsel %vm225_vm0, %v222_v10, %v223_v18  ;;  %v217_v33 = vsel %vm214_vm2, %v208_v16, %v209_v14  ;;  %v216_v34 = vsel %vm214_vm2, %v209_v14, %v210_v17  ;;  %742 = vmatpush3.bf16.msra.mxu1 %v741_v5  ;;  %v115_v10 = vld [vmem:[#allocation5 + $0xb8] sm:$0xff]  ;;  %v117_v16 = vld [vmem:[#allocation5 + $0xc8] sm:$0xff]  ;;  %v120_v28 = vld [vmem:[#allocation5 + $0xe0] sm:$0xff] }
  0xb2   :  { %v211_v35 = vrot.slane %v206_v27, 7  ;;  %v224_v36 = vrot.slane %v206_v27, 1  ;;  %242 = vrot.lane.b32.xlu0 %v205_v12, %s887_s0  ;;  %244 = vrot.lane.b32.xlu1 %v206_v27, %s887_s0  ;;  %v743_v11 = vpack.c.bf16 %v115_v10, %v114_v8  ;;  %v98_v12 = vld [vmem:[#allocation5 + $0x30] sm:$0xff]  ;;  %v753_v27 = vpack.c.bf16 %v103_v26, %v102_v25 }
  0xb4   :  { %v219_v39 = vsel %vm214_vm2, %v211_v35, %v207_v13  ;;  %v226_v40 = vsel %vm225_vm0, %v223_v18, %v224_v36  ;;  %v230_v41 = vsel %vm225_vm0, %v224_v36, %v220_v15  ;;  %v215_v42 = vsel %vm214_vm2, %v210_v17, %v211_v35  ;;  %v99_v13 = vld [vmem:[#allocation5 + $0x38] sm:$0xff]  ;;  %744 = vmatprep.subr.bf16.mxu1 %v743_v11  ;;  %v116_v15 = vld [vmem:[#allocation5 + $0xc0] sm:$0xff] }
  0xb5   :  { %v745_v14 = vpack.c.bf16 %v99_v13, %v98_v12  ;;  %v747_v17 = vpack.c.bf16 %v117_v16, %v116_v15  ;;  %v100_v18 = vld [vmem:[#allocation5 + $0x40] sm:$0xff]  ;;  %v123_v35 = vld [vmem:[#allocation5 + $0xf8] sm:$0xff] }
  0xb6   :  { %v749_v20 = vpack.c.bf16 %v101_v19, %v100_v18 }
  0xb7   :  { %746 = vmatpush3.bf16.msra.mxu1 %v745_v14 }
  0xb8   :  { %748 = vmatprep.subr.bf16.mxu1 %v747_v17 }
  0xbb   :  { %750 = vmatpush3.bf16.msra.mxu1 %v749_v20 }
  0xbc   :  { %752 = vmatprep.subr.bf16.mxu1 %v751_v24 }
  0xbf   :  { %754 = vmatpush3.bf16.msra.mxu1 %v753_v27 }
 0x11c   :  { %v237_v43 = vpop.permute.xlu1 %236 }
 0x11d   :  { %v252_v46 = vsel %vm251_vm1, %v219_v39, %v237_v43  ;;  %v761_v39 = vpack.c.bf16 %v107_v38, %v106_v37 }
 0x11e   :  { %337 = vmatmul.mubr.f32.vlgmr.msra.gmra.mrb[0].mxu0 %v252_v46 }
 0x11f   :  { %637 = vmatprep.mubr.msk.f32.mxu0 %vm251_vm1, %v228_v29  ;;  %v121_v29 = vld [vmem:[#allocation5 + $0xe8] sm:$0xff] }
 0x120   :  { %v239_v47 = vpop.permute.xlu0 %238  ;;  %v241_v51 = vpop.permute.xlu1 %240 }
 0x121   :  { %v253_v48 = vsel %vm251_vm1, %v218_v30, %v239_v47  ;;  %v254_v52 = vsel %vm251_vm1, %v217_v33, %v241_v51  ;;  %v755_v30 = vpack.c.bf16 %v121_v29, %v120_v28  ;;  %v124_v28 = vld [vmem:[#allocation5 + $0x100] sm:$0xff]  ;;  %v125_v29 = vld [vmem:[#allocation5 + $0x108] sm:$0xff] }
 0x122   :  { %342 = vmatmul.mubr.f32.gmra.mrb[2].mxu0 %v253_v48 }
 0x123   :  { %638 = vmatprep.mubr.msk.f32.mxu0 %vm251_vm1, %v227_v32  ;;  %v105_v32 = vld [vmem:[#allocation5 + $0x68] sm:$0xff]  ;;  %756 = vmatprep.subr.bf16.mxu1 %v755_v30 }
 0x124   :  { %v243_v53 = vpop.permute.xlu0 %242  ;;  %v245_v56 = vpop.permute.xlu1 %244  ;;  %v757_v33 = vpack.c.bf16 %v105_v32, %v104_v31 }
 0x125   :  { %v255_v54 = vsel %vm251_vm1, %v216_v34, %v243_v53  ;;  %v256_v57 = vsel %vm251_vm1, %v215_v42, %v245_v56  ;;  %v122_v34 = vld [vmem:[#allocation5 + $0xf0] sm:$0xff]  ;;  %v642_v42 = vld [vmem:[%s1171_s7] ss:$0 sm:$0xff] }
 0x126   :  { %347 = vmatmul.mubr.f32.gmra.mrb[4].mxu0 %v254_v52  ;;  %758 = vmatpush3.bf16.msra.mxu1 %v757_v33  ;;  %v759_v36 = vpack.c.bf16 %v123_v35, %v122_v34  ;;  %v126_v35 = vld [vmem:[#allocation5 + $0x110] sm:$0xff] }
 0x127   :  { %639 = vmatprep.mubr.msk.f32.mxu0 %vm251_vm1, %v226_v40  ;;  %v641_v40 = vld [vmem:[%s1170_s6] ss:$0 sm:$0xff]  ;;  %s888_s6 = smov [#allocation7]  }
 0x128   :  { %760 = vmatprep.subr.bf16.mxu1 %v759_v36  ;;  %v127_v36 = vld [vmem:[#allocation5 + $0x118] sm:$0xff]  ;;  %s621_s7 = sshll.u32 %s888_s6, 4  ;;  %s622_s7 = int_to_ptr.vmem [resolvable:$true] %s621_s7 }
 0x129   :  { %s853_s11 = scalar_lea.vmem %s622_s7, 640  ;;  %p858_p3 = scmp.lt.s32.totalorder %s622_s7, %s622_s7 }
 0x12a   :  { %352 = vmatmul.mubr.f32.gmra.mrb[6].mxu0 %v255_v54  ;;  %762 = vmatpush3.bf16.msra.mxu1 %v761_v39  ;;  %p854_p2 = scmp.ne.s32.totalorder %s622_s7, %s853_s11  ;;  %p859_p4 = scmp.lt.s32.totalorder %s853_s11, %s853_s11 }
 0x12b   :  { %640 = vmatprep.mubr.msk.f32.mxu0 %vm251_vm1, %v230_v41  ;;  %763 = vmatprep.subr.bf16.mxu1 %v886_v9 }
 0x12c   :  { %p860_p5 = por %p859_p4, %p858_p3 }
 0x12e   :  { %357 = vmatmul.mubr.f32.gmra.mrb[8].mxu0 %v256_v57  ;;  %p861_p6 = pnand %p860_p5, %p854_p2 }
 0x1f1   :  { %v338_v41 = vpop.f32.mrb[0].mxu0 }
 0x1f2   :  { %v369_v43 = vmul.f32 %v641_v40, %v338_v41  ;;  %v340_v46 = vpop.f32.mrb[1].mxu0  ;;  %v128_v41 = vld [vmem:[#allocation5 + $0x120] sm:$0xff] }
 0x1f3   :  { %v130_v46 = vld [vmem:[#allocation5 + $0x130] sm:$0xff] }
 0x1f4   :  { %v381_v47 = vadd.f32 %v642_v42, %v369_v43 }
 0x1f5   :  { %v343_v48 = vpop.f32.mrb[2].mxu0 }
 0x1f6   :  { %v386_v51 = vmax.f32 %v381_v47, 0.0  ;;  %v370_v52 = vmul.f32 %v641_v40, %v343_v48  ;;  %v345_v53 = vpop.f32.mrb[3].mxu0  ;;  %v131_v47 = vld [vmem:[#allocation5 + $0x138] sm:$0xff]  ;;  %v132_v48 = vld [vmem:[#allocation5 + $0x140] sm:$0xff] }
 0x1f7   :  { %v773_v1 = vpack.c.bf16 %v131_v47, %v130_v46  ;;  %v134_v53 = vld [vmem:[#allocation5 + $0x150] sm:$0xff] }
 0x1f8   :  { %v382_v54 = vadd.f32 %v642_v42, %v370_v52  ;;  %v391_v56 = vmul.f32 %v386_v51, %v1027_v62  ;;  %v133_v51 = vld [vmem:[#allocation5 + $0x148] sm:$0xff] }
 0x1f9   :  { %v348_v57 = vpop.f32.mrb[4].mxu0  ;;  %v776_v52 = vpack.c.bf16 %v133_v51, %v132_v48 }
 0x1fa   :  { %v387_v58 = vmax.f32 %v382_v54, 0.0  ;;  %v371_v59 = vmul.f32 %v641_v40, %v348_v57  ;;  %v350_v60 = vpop.f32.mrb[5].mxu0  ;;  %495 = vmatprep.mubr.f32.mxu1 %v391_v56  ;;  %v406_v2 = vrot.slane %v391_v56, 1  ;;  %v396_v4 = vrot.slane %v391_v56, 7  ;;  %v135_v54 = vld [vmem:[#allocation5 + $0x158] sm:$0xff]  ;;  %v136_v57 = vld [vmem:[#allocation5 + $0x160] sm:$0xff] }
 0x1fb   :  { %v779_v56 = vpack.c.bf16 %v135_v54, %v134_v53  ;;  %v138_v60 = vld [vmem:[#allocation5 + $0x170] sm:$0xff] }
 0x1fc   :  { %v383_v61 = vadd.f32 %v642_v42, %v371_v59  ;;  %v392_v0 = vmul.f32 %v387_v58, %v1036_v6  ;;  %v137_v58 = vld [vmem:[#allocation5 + $0x168] sm:$0xff] }
 0x1fd   :  { %v353_v3 = vpop.f32.mrb[6].mxu0  ;;  %v782_v59 = vpack.c.bf16 %v137_v58, %v136_v57 }
 0x1fe   :  { %v388_v5 = vmax.f32 %v383_v61, 0.0  ;;  %v372_v8 = vmul.f32 %v641_v40, %v353_v3  ;;  %v355_v10 = vpop.f32.mrb[7].mxu0  ;;  %v407_v11 = vrot.slane %v392_v0, 1  ;;  %v397_v12 = vrot.slane %v392_v0, 7  ;;  %v139_v61 = vld [vmem:[#allocation5 + $0x178] sm:$0xff]  ;;  %v141_v3 = vld [vmem:[#allocation5 + $0x188] sm:$0xff] }
 0x1ff   :  { %v144_v10 = vld [vmem:[#allocation5 + $0x1a0] sm:$0xff] }
 0x200   :  { %v384_v13 = vadd.f32 %v642_v42, %v372_v8  ;;  %v404_v62 = vsel %vm214_vm2, %v396_v4, %v397_v12  ;;  %v393_v14 = vmul.f32 %v388_v5, %v1029_v63  ;;  %v1095_v15 = vsel %vm225_vm0, %v406_v2, %v407_v11  ;;  %v143_v5 = vld [vmem:[#allocation5 + $0x198] sm:$0xff] }
 0x201   :  { %v358_v16 = vpop.f32.mrb[8].mxu0 }
 0x202   :  { %v389_v6 = vmax.f32 %v384_v13, 0.0  ;;  %v373_v17 = vmul.f32 %v641_v40, %v358_v16  ;;  %v360_v18 = vpop.f32.mrb[9].mxu0  ;;  %v398_v19 = vrot.slane %v393_v14, 7  ;;  %v408_v20 = vrot.slane %v393_v14, 1  ;;  %v146_v13 = vld [vmem:[#allocation5 + $0x1b0] sm:$0xff] }
 0x203   :  { %v767_v40 = vpack.c.bf16 %v127_v36, %v126_v35 }
 0x204   :  { %v385_v21 = vadd.f32 %v642_v42, %v373_v17  ;;  %v403_v23 = vsel %vm214_vm2, %v397_v12, %v398_v19  ;;  %v394_v24 = vmul.f32 %v389_v6, %v1038_v7  ;;  %v1102_v25 = vsel %vm225_vm0, %v407_v11, %v408_v20  ;;  %v129_v42 = vld [vmem:[#allocation5 + $0x128] sm:$0xff] }
 0x205   :  { %v764_v7 = vpack.c.bf16 %v125_v29, %v124_v28  ;;  %v770_v43 = vpack.c.bf16 %v129_v42, %v128_v41  ;;  %v145_v11 = vld [vmem:[#allocation5 + $0x1a8] sm:$0xff] }
 0x206   :  { %v390_v63 = vmax.f32 %v385_v21, 0.0  ;;  %v399_v26 = vrot.slane %v394_v24, 7  ;;  %v409_v27 = vrot.slane %v394_v24, 1  ;;  %v794_v12 = vpack.c.bf16 %v145_v11, %v144_v10 }
 0x208   :  { %v395_v30 = vmul.f32 %v390_v63, %v1046_v22  ;;  %v402_v31 = vsel %vm214_vm2, %v398_v19, %v399_v26  ;;  %v1109_v32 = vsel %vm225_vm0, %v408_v20, %v409_v27 }
 0x20a   :  { %v400_v33 = vrot.slane %v395_v30, 7  ;;  %v410_v34 = vrot.slane %v395_v30, 1 }
 0x20c   :  { %v405_v37 = vsel %vm214_vm2, %v400_v33, %v396_v4  ;;  %v401_v38 = vsel %vm214_vm2, %v399_v26, %v400_v33  ;;  %v1117_v22 = vsel %vm225_vm0, %v409_v27, %v410_v34  ;;  %v1121_v39 = vsel %vm225_vm0, %v410_v34, %v406_v2  ;;  %v140_v2 = vld [vmem:[#allocation5 + $0x180] sm:$0xff] }
 0x20d   :  { %496 = vmatmul.mubr.f32.vlgmr.msra.gmra.mrb[0].mxu1 %v405_v37  ;;  %v788_v4 = vpack.c.bf16 %v141_v3, %v140_v2 }
 0x20e   :  { %765 = vmatpush1.bf16.msra.mxu1 %v764_v7  ;;  %500 = vmatprep.mubr.f32.mxu1 %v392_v0  ;;  %v785_v0 = vpack.c.bf16 %v139_v61, %v138_v60 }
 0x20f   :  { %766 = vmatprep.subr.bf16.mxu1 %v886_v9 }
 0x211   :  { %501 = vmatmul.mubr.f32.gmra.mrb[2].mxu1 %v404_v62  ;;  %v147_v62 = vld [vmem:[#allocation5 + $0x1b8] sm:$0xff] }
 0x212   :  { %768 = vmatpush1.bf16.msra.mxu1 %v767_v40  ;;  %505 = vmatprep.mubr.f32.mxu1 %v393_v14  ;;  %v797_v14 = vpack.c.bf16 %v147_v62, %v146_v13 }
 0x213   :  { %769 = vmatprep.subr.bf16.mxu1 %v886_v9 }
 0x215   :  { %506 = vmatmul.mubr.f32.gmra.mrb[4].mxu1 %v403_v23 }
 0x216   :  { %771 = vmatpush1.bf16.msra.mxu1 %v770_v43  ;;  %510 = vmatprep.mubr.f32.mxu1 %v394_v24 }
 0x217   :  { %772 = vmatprep.subr.bf16.mxu1 %v886_v9 }
 0x219   :  { %511 = vmatmul.mubr.f32.gmra.mrb[6].mxu1 %v402_v31 }
 0x21a   :  { %774 = vmatpush1.bf16.msra.mxu1 %v773_v1  ;;  %515 = vmatprep.mubr.f32.mxu1 %v395_v30 }
 0x21b   :  { %775 = vmatprep.subr.bf16.mxu1 %v886_v9 }
 0x21d   :  { %516 = vmatmul.mubr.f32.gmra.mrb[8].mxu1 %v401_v38 }
 0x21e   :  { %777 = vmatpush1.bf16.msra.mxu1 %v776_v52  ;;  %643 = vmatprep.mubr.msk.f32.mxu1 %vm251_vm1, %v997_v44  ;;  %v142_v44 = vld [vmem:[#allocation5 + $0x190] sm:$0xff] }
 0x21f   :  { %778 = vmatprep.subr.bf16.mxu1 %v886_v9  ;;  %v791_v8 = vpack.c.bf16 %v143_v5, %v142_v44 }
 0x222   :  { %780 = vmatpush1.bf16.msra.mxu1 %v779_v56 }
 0x223   :  { %781 = vmatprep.subr.bf16.mxu1 %v886_v9 }
 0x226   :  { %783 = vmatpush1.bf16.msra.mxu1 %v782_v59 }
 0x227   :  { %784 = vmatprep.subr.bf16.mxu1 %v886_v9 }
 0x22a   :  { %786 = vmatpush1.bf16.msra.mxu1 %v785_v0 }
 0x22b   :  { %787 = vmatprep.subr.bf16.mxu1 %v886_v9 }
 0x22e   :  { %789 = vmatpush1.bf16.msra.mxu1 %v788_v4 }
 0x22f   :  { %790 = vmatprep.subr.bf16.mxu1 %v886_v9 }
 0x232   :  { %792 = vmatpush1.bf16.msra.mxu1 %v791_v8 }
 0x233   :  { %793 = vmatprep.subr.bf16.mxu1 %v886_v9 }
 0x236   :  { %795 = vmatpush1.bf16.msra.mxu1 %v794_v12 }
 0x237   :  { %796 = vmatprep.subr.bf16.mxu1 %v886_v9 }
 0x23a   :  { %798 = vmatpush1.bf16.msra.mxu1 %v797_v14 }
 0x23d   :  { %586 = vmatmul.mubr.f32.vlgmr.msra.gmra.mrb[10].mxu1 %v1095_v15 }
 0x23e   :  { %644 = vmatprep.mubr.msk.f32.mxu1 %vm251_vm1, %v1012_v49 }
 0x241   :  { %591 = vmatmul.mubr.f32.gmra.mrb[12].mxu1 %v1102_v25 }
 0x242   :  { %645 = vmatprep.mubr.msk.f32.mxu1 %vm251_vm1, %v1002_v45 }
 0x245   :  { %596 = vmatmul.mubr.f32.gmra.mrb[14].mxu1 %v1109_v32 }
 0x246   :  { %646 = vmatprep.mubr.msk.f32.mxu1 %vm251_vm1, %v1017_v50 }
 0x249   :  { %601 = vmatmul.mubr.f32.gmra.mrb[16].mxu1 %v1117_v22 }
 0x24a   :  { %647 = vmatprep.mubr.msk.f32.mxu1 %vm251_vm1, %v1024_v55 }
 0x24d   :  { %606 = vmatmul.mubr.f32.gmra.mrb[18].mxu1 %v1121_v39 }
 0x2e0   :  { %v680_v9 = vpop.f32.mrb[0].mxu1 }
 0x2e1   :  { %v681_v15 = vpop.f32.mrb[1].mxu1 }
 0x2e2   :  { %v682_v49 = vadd.f32 %v681_v15, %v680_v9 }
 0x2e4   :  { %v683_v16 = vpop.f32.mrb[2].mxu1 }
 0x2e5   :  { %v684_v6 = vpop.f32.mrb[3].mxu1 }
 0x2e6   :  { %v685_v17 = vadd.f32 %v684_v6, %v683_v16 }
 0x2e8   :  { %v686_v18 = vpop.f32.mrb[4].mxu1 }
 0x2e9   :  { %v687_v45 = vpop.f32.mrb[5].mxu1 }
 0x2ea   :  { %v688_v19 = vadd.f32 %v687_v45, %v686_v18 }
 0x2ec   :  { %v689_v20 = vpop.f32.mrb[6].mxu1 }
 0x2ed   :  { %v690_v21 = vpop.f32.mrb[7].mxu1 }
 0x2ee   :  { %v691_v23 = vadd.f32 %v690_v21, %v689_v20 }
 0x2f0   :  { %v692_v50 = vpop.f32.mrb[8].mxu1 }
 0x2f1   :  { %v693_v24 = vpop.f32.mrb[9].mxu1 }
 0x2f2   :  { %v694_v25 = vadd.f32 %v693_v24, %v692_v50 }
 0x310   :  { %v587_v63 = vpop.f32.mrb[10].mxu1 }
 0x311   :  { %v588_v26 = vadd.f32 %v682_v49, %v587_v63  ;;  %v589_v55 = vpop.f32.mrb[11].mxu1 }
 0x313   :  { %611 = vst [vmem:[#allocation7] sm:$0xff] %v588_v26 }
 0x314   :  { %v592_v27 = vpop.f32.mrb[12].mxu1 }
 0x315   :  { %v593_v28 = vadd.f32 %v685_v17, %v592_v27  ;;  %v594_v29 = vpop.f32.mrb[13].mxu1 }
 0x317   :  { %612 = vst [vmem:[#allocation7 + $0x8] sm:$0xff] %v593_v28 }
 0x318   :  { %v597_v30 = vpop.f32.mrb[14].mxu1 }
 0x319   :  { %v598_v31 = vadd.f32 %v688_v19, %v597_v30  ;;  %v599_v32 = vpop.f32.mrb[15].mxu1 }
 0x31b   :  { %613 = vst [vmem:[#allocation7 + $0x10] sm:$0xff] %v598_v31 }
 0x31c   :  { %v602_v33 = vpop.f32.mrb[16].mxu1 }
 0x31d   :  { %v603_v7 = vadd.f32 %v691_v23, %v602_v33  ;;  %v604_v34 = vpop.f32.mrb[17].mxu1 }
 0x31f   :  { %614 = vst [vmem:[#allocation7 + $0x18] sm:$0xff] %v603_v7 }
 0x320   :  { %v607_v35 = vpop.f32.mrb[18].mxu1 }
 0x321   :  { %v608_v36 = vadd.f32 %v694_v25, %v607_v35  ;;  %v609_v37 = vpop.f32.mrb[19].mxu1 }
 0x323   :  { %615 = vst [vmem:[#allocation7 + $0x20] sm:$0xff] %v608_v36 }
 0x324   :  { %864 = shalt.err (!%p861_p6)
}
 0x325   :  { %s865_s3 = scalar_lea.hbm %s1172_s8, 640 }
 0x326   :  { %p866_p7 = scmp.ne.s32.totalorder %s1172_s8, %s865_s3  ;;  %p869_p8 = scmp.lt.u32.totalorder %s865_s3, %s1172_s8 }
 0x328   :  { %p871_p9 = pnand %p869_p8, %p866_p7 }
 0x32a   :  { %874 = shalt.err (!%p871_p9)
}
 0x32b   :  { %627 = dma.vmem_to_hbm [thread:$0]  %s622_s7, 640, %s1172_s8, [#allocation4], %s882_s15, %s882_s15, %s883_s16  }
 0x32c   :  { %879 = dma.done.wait [#allocation4], 640  }
 0x32d   :  { %880 = vsyncadd [#allocation4], 4294966656 }
 0x32e   :  { %631 = vsyncpa [#allocation3], 1 }
 0x32f   :  { %632 = vsyncpa [#allocation6], 1 }
 0x330   :  { %633 = vsyncpa [#allocation4], 1 }

</bundles_post_ra>
